<compile_context>
chip_gen: v7x
topology: tpu7x:2x2x1
jax: 0.10.0
libtpu: 0.0.40
codegen_flags: <defaults>
</compile_context>

<pallas_src>
import functools
import math

import jax
import jax.numpy as jnp
from jax.experimental import pallas as pl
from jax.experimental.pallas import tpu as pltpu

D_MODEL = 10
DROPOUT_P = 0.1
MAX_LEN = 5000

_LANES = 512           # lane-dense row width (multiple of 128)
_MAX_TILE_ROWS = 256   # 256 * 512 * 4 B = 512 KiB per operand buffer


def _build_pe(max_len: int, d_model: int) -> jnp.ndarray:
    """Sinusoidal positional-encoding buffer, shape (max_len, 1, d_model)."""
    position = jnp.arange(max_len, dtype=jnp.float32)[:, None]          # (max_len, 1)
    denom = jnp.exp(jnp.arange(0, d_model, 2, dtype=jnp.float32)
                    * (-math.log(10000.0) / d_model))                   # (d_model//2,)
    pe = jnp.zeros((max_len, 1, d_model), dtype=jnp.float32)
    pe = pe.at[:, 0, 0::2].set(jnp.sin(position * denom))
    pe = pe.at[:, 0, 1::2].set(jnp.cos(position * denom))
    return pe


def _add_pe_dropout_kernel(seed_ref, x_ref, pe_ref, o_ref, *,
                           threshold: int, scale: float,
                           tile_rows: int, lanes: int):
    """out = dropout(x + pe) on a lane-dense (tile_rows, lanes) slab."""
    y = x_ref[...] + pe_ref[...]

    # Counter-based PRNG: hash(global element index ^ seed) -> uniform uint32.
    row = jax.lax.broadcasted_iota(jnp.int32, (tile_rows, lanes), 0).astype(jnp.uint32)
    col = jax.lax.broadcasted_iota(jnp.int32, (tile_rows, lanes), 1).astype(jnp.uint32)
    base = (pl.program_id(0) * tile_rows).astype(jnp.uint32)
    idx = (base + row) * jnp.uint32(lanes) + col
    h = idx ^ seed_ref[0].astype(jnp.uint32)
    # lowbias32 integer mixer
    h = h ^ (h >> 16)
    h = h * jnp.uint32(0x7FEB352D)
    h = h ^ (h >> 15)
    h = h * jnp.uint32(0x846CA68B)
    h = h ^ (h >> 16)

    # Integer-threshold compare: keep with prob (1 - p); inverted-dropout scale.
    keep = h >= jnp.uint32(threshold)
    y = jnp.where(keep, y * jnp.float32(scale), jnp.zeros_like(y))
    o_ref[...] = y.astype(o_ref.dtype)


def positional_encoding(x, pe_buffer, *, seed: int = 0,
                        p: float = DROPOUT_P, training: bool = True):
    """x: (seq_len, batch, d_model). Returns same shape/dtype."""
    S, B, D = x.shape
    dtype = x.dtype
    pe = pe_buffer[:S].astype(dtype)                      # (S, 1, D)

    apply_dropout = bool(training) and float(p) > 0.0
    if not apply_dropout:
        # Trivial broadcast-add: let XLA fuse it, no pallas launch overhead.
        return x + pe
    assert 0.0 < float(p) < 1.0, "dropout p must be in [0, 1)"

    # Pre-broadcast pe over batch, flatten both operands to a lane-dense slab.
    pe_full = jnp.broadcast_to(pe, (S, B, D))
    n = S * B * D
    rows = -(-n // _LANES)
    if rows <= _MAX_TILE_ROWS:
        tile_rows = rows                                  # single full-array block
        rows_padded = rows
    else:
        tile_rows = _MAX_TILE_ROWS                        # multiple of 8
        rows_padded = -(-rows // tile_rows) * tile_rows
    n_padded = rows_padded * _LANES

    def to_slab(a):
        flat = jnp.reshape(a, (-1,))
        if n_padded != n:
            flat = jnp.pad(flat, (0, n_padded - n))
        return jnp.reshape(flat, (rows_padded, _LANES))

    x_slab = to_slab(x)
    pe_slab = to_slab(pe_full)
    seed_arr = jnp.asarray([seed], dtype=jnp.int32)

    threshold = int(round(float(p) * float(2 ** 32)))
    scale = 1.0 / (1.0 - float(p))

    kernel = functools.partial(
        _add_pe_dropout_kernel,
        threshold=threshold, scale=scale,
        tile_rows=tile_rows, lanes=_LANES)

    block = pl.BlockSpec((tile_rows, _LANES), lambda i, seed_ref: (i, 0))
    out_slab = pl.pallas_call(
        kernel,
        out_shape=jax.ShapeDtypeStruct((rows_padded, _LANES), dtype),
        grid_spec=pltpu.PrefetchScalarGridSpec(
            num_scalar_prefetch=1,
            grid=(rows_padded // tile_rows,),
            in_specs=[block, block],
            out_specs=block,
        ),
        compiler_params=pltpu.CompilerParams(
            dimension_semantics=("parallel",)),
    )(seed_arr, x_slab, pe_slab)

    # Drop tail padding and restore the (seq_len, batch, d_model) layout.
    return jnp.reshape(jnp.reshape(out_slab, (-1,))[:n], (S, B, D))


if __name__ == "__main__":
    key = jax.random.PRNGKey(0)
    seq_len, batch = 8, 2
    x = jax.random.normal(key, (seq_len, batch, D_MODEL), dtype=jnp.float32)
    pe_buffer = _build_pe(MAX_LEN, D_MODEL)

    ref = x + pe_buffer[:seq_len]                          # (S, B, D) via broadcast

    # Eval mode (dropout disabled): plain XLA broadcast-add path.
    out_eval = jax.block_until_ready(
        positional_encoding(x, pe_buffer, p=DROPOUT_P, training=False))
    assert jnp.allclose(out_eval, ref, atol=1e-6), "eval-mode mismatch"

    # Train mode: Pallas kernel (fused add + inverted dropout).
    out_train = jax.block_until_ready(
        positional_encoding(x, pe_buffer, seed=1234, p=DROPOUT_P, training=True))
    assert out_train.shape == (seq_len, batch, D_MODEL)
    scale = 1.0 / (1.0 - DROPOUT_P)
    ok = jnp.isclose(out_train, ref * scale, atol=1e-5) | (out_train == 0.0)
    assert bool(jnp.all(ok)), "train-mode dropout semantics mismatch"
    drop_frac = float(jnp.mean((out_train == 0.0).astype(jnp.float32)))
    assert drop_frac < 0.5, "implausible dropout rate for p=0.1"

    print("KERNEL_OK")
</pallas_src>

<mosaic_0001>
module attributes {stable_mosaic.version = 11 : i64} {
  func.func @_add_pe_dropout_kernel(%arg0: i32, %arg1: memref<1xi32, #tpu.memory_space<smem>>, %arg2: memref<1x512xf32, #tpu.memory_space<vmem>>, %arg3: memref<1x512xf32, #tpu.memory_space<vmem>>, %arg4: memref<1x512xf32, #tpu.memory_space<vmem>>) attributes {dimension_semantics = [#tpu.dimension_semantics<parallel>], iteration_bounds = array<i64: 1>, scalar_prefetch = 1 : i64, scratch_operands = 0 : i64, tpu.core_type = #tpu.core_type<tc>, window_params = [{transform_indices = @transform_0, window_bounds = array<i64: 1, 512>}, {transform_indices = @transform_1, window_bounds = array<i64: 1, 512>}, {transform_indices = @transform_2, window_bounds = array<i64: 1, 512>}]} {
    %c0 = arith.constant 0 : index
    %c0_0 = arith.constant 0 : index
    %0 = vector.load %arg2[%c0, %c0_0] : memref<1x512xf32, #tpu.memory_space<vmem>>, vector<1x512xf32>
    %c0_1 = arith.constant 0 : index
    %c0_2 = arith.constant 0 : index
    %1 = vector.load %arg3[%c0_1, %c0_2] : memref<1x512xf32, #tpu.memory_space<vmem>>, vector<1x512xf32>
    %2 = arith.addf %0, %1 : vector<1x512xf32>
    %3 = tpu.iota {dimensions = array<i32: 0>} : vector<1x512xi32>
    %4 = tpu.iota {dimensions = array<i32: 1>} : vector<1x512xi32>
    %c1_i32 = arith.constant 1 : i32
    %5 = arith.muli %arg0, %c1_i32 : i32
    %6 = vector.broadcast %5 : i32 to vector<1x512xi32>
    %7 = arith.addi %6, %3 : vector<1x512xi32>
    %c512_i32 = arith.constant 512 : i32
    %8 = vector.broadcast %c512_i32 : i32 to vector<1x512xi32>
    %9 = arith.muli %7, %8 : vector<1x512xi32>
    %10 = arith.addi %9, %4 : vector<1x512xi32>
    %c0_3 = arith.constant 0 : index
    %11 = memref.load %arg1[%c0_3] : memref<1xi32, #tpu.memory_space<smem>>
    %12 = vector.broadcast %11 : i32 to vector<1x512xi32>
    %13 = arith.xori %10, %12 : vector<1x512xi32>
    %c16_i32 = arith.constant 16 : i32
    %14 = vector.broadcast %c16_i32 : i32 to vector<1x512xi32>
    %15 = arith.shrui %13, %14 : vector<1x512xi32>
    %16 = arith.xori %13, %15 : vector<1x512xi32>
    %c2146121005_i32 = arith.constant 2146121005 : i32
    %17 = vector.broadcast %c2146121005_i32 : i32 to vector<1x512xi32>
    %18 = arith.muli %16, %17 : vector<1x512xi32>
    %c15_i32 = arith.constant 15 : i32
    %19 = vector.broadcast %c15_i32 : i32 to vector<1x512xi32>
    %20 = arith.shrui %18, %19 : vector<1x512xi32>
    %21 = arith.xori %18, %20 : vector<1x512xi32>
    %c-2073254261_i32 = arith.constant -2073254261 : i32
    %22 = vector.broadcast %c-2073254261_i32 : i32 to vector<1x512xi32>
    %23 = arith.muli %21, %22 : vector<1x512xi32>
    %c16_i32_4 = arith.constant 16 : i32
    %24 = vector.broadcast %c16_i32_4 : i32 to vector<1x512xi32>
    %25 = arith.shrui %23, %24 : vector<1x512xi32>
    %26 = arith.xori %23, %25 : vector<1x512xi32>
    %c429496730_i32 = arith.constant 429496730 : i32
    %27 = vector.broadcast %c429496730_i32 : i32 to vector<1x512xi32>
    %28 = arith.cmpi uge, %26, %27 : vector<1x512xi32>
    %cst = arith.constant 1.11111116 : f32
    %29 = vector.broadcast %cst : f32 to vector<1x512xf32>
    %30 = arith.mulf %2, %29 : vector<1x512xf32>
    %cst_5 = arith.constant 0.000000e+00 : f32
    %31 = vector.broadcast %cst_5 : f32 to vector<1x512xf32>
    %32 = arith.select %28, %30, %31 : vector<1x512xi1>, vector<1x512xf32>
    %c0_6 = arith.constant 0 : index
    %c0_7 = arith.constant 0 : index
    %33 = vector.load %arg4[%c0_6, %c0_7] : memref<1x512xf32, #tpu.memory_space<vmem>>, vector<1x512xf32>
    tpu.vector_store %arg4[%c0_6, %c0_7], %32 {strides = array<i32>} : memref<1x512xf32, #tpu.memory_space<vmem>>, vector<1x512xf32>,
    return
  }
  func.func @transform_0(%arg0: i32, %arg1: memref<1xi32, #tpu.memory_space<smem>>) -> (i32, i32) {
    %c0_i32 = arith.constant 0 : i32
    %c0_i32_0 = arith.constant 0 : i32
    return %arg0, %c0_i32 : i32, i32
  }
  func.func @transform_1(%arg0: i32, %arg1: memref<1xi32, #tpu.memory_space<smem>>) -> (i32, i32) {
    %c0_i32 = arith.constant 0 : i32
    %c0_i32_0 = arith.constant 0 : i32
    return %arg0, %c0_i32 : i32, i32
  }
  func.func @transform_2(%arg0: i32, %arg1: memref<1xi32, #tpu.memory_space<smem>>) -> (i32, i32) {
    %c0_i32 = arith.constant 0 : i32
    %c0_i32_0 = arith.constant 0 : i32
    return %arg0, %c0_i32 : i32, i32
  }
}

</mosaic_0001>

<bundles_post_ra>
// kernel: tpu_custom_call.1
= control target key start
LH: loop header
LB: loop body
LE: loop exit
PB: predicated region body
PF: predicated region fallthrough
CT: control target
= control target key end

     0   :  { %9 = vsyncpa [#allocation5], 0  ;;  %s275_s0 = inlined_call_operand.<no memory space> [shape: s32[1], index: 0, kind: input, shape index: {}]   ;;  %s276_s1 = inlined_call_operand.hbm [shape: f32[1,512], index: 1, kind: input, shape index: {}]   ;;  %s277_s2 = inlined_call_operand.vmem [shape: f32[1,512], index: 2, kind: input, shape index: {}]   ;;  %s278_s3 = inlined_call_operand.hbm [shape: f32[1,512], index: 3, kind: output, shape index: {}]  }
   0x1   :  { %10 = vsyncpa [#allocation6], 0  ;;  %s211_s12 = smov [#allocation4]   ;;  %s163_s16 = scalar_lea.hbm %s276_s1, 64 }
   0x2   :  { %s17_s13 = sshll.u32 %s211_s12, 4  ;;  %p164_p0 = scmp.ne.s32.totalorder %s276_s1, %s163_s16  ;;  %s18_s13 = int_to_ptr.vmem [resolvable:$true] %s17_s13 }
   0x3   :  { %p167_p1 = scmp.lt.u32.totalorder %s163_s16, %s276_s1 }
   0x5   :  { %p169_p2 = pnand %p167_p1, %p164_p0 }
   0x7   :  { %172 = shalt.err (!%p169_p2)
}
   0x8   :  { %s173_s21 = scalar_lea.vmem %s18_s13, 64  ;;  %p178_p4 = scmp.lt.s32.totalorder %s18_s13, %s18_s13 }
   0x9   :  { %p174_p3 = scmp.ne.s32.totalorder %s18_s13, %s173_s21  ;;  %p179_p5 = scmp.lt.s32.totalorder %s173_s21, %s173_s21 }
   0xb   :  { %p180_p6 = por %p179_p5, %p178_p4 }
   0xd   :  { %p181_p7 = pnand %p180_p6, %p174_p3 }
   0xf   :  { %184 = shalt.err (!%p181_p7)
}
  0x10   :  { %20 = dma.hbm_to_vmem [thread:$0]  %s276_s1, 64, %s18_s13, [#allocation5]  }
  0x11   :  { %207 = dma.done.wait [#allocation5], 64  }
  0x12   :  { %208 = vsyncadd [#allocation5], 4294967232  ;;  %v29_v0 = vlaneseq  ;;  %v44_v7 = vstv %s275_s0  ;;  %v26_v20 = vld [vmem:[#allocation4] sm:$0xf]  ;;  %v212_v38 = vmov 1966171168  }
  0x13   :  { %v27_v21 = vld [vmem:[%s277_s2] sm:$0xf]  ;;  %v118_v39 = vunpack.c.l.s4 %v212_v38  ;;  %s213_s0 = smov [#allocation7]  }
  0x14   :  { %v247_v1 = vshrl.u32 %v29_v0, 7  ;;  %v32_v2 = vand.u32 127, %v29_v0  ;;  %v28_v28 = vadd.f32 %v27_v21, %v26_v20  ;;  %s151_s2 = sshll.u32 %s213_s0, 4  ;;  %vm142_vm4 = vcmp.lt.s32.totalorder %v29_v0, 512  ;;  %s152_s2 = int_to_ptr.vmem [resolvable:$true] %s151_s2 }
  0x15   :  { %v119_v52 = vunpack.c.0.s8 %v118_v39  ;;  %s185_s27 = scalar_lea.vmem %s152_s2, 64  ;;  %p190_p9 = scmp.lt.s32.totalorder %s152_s2, %s152_s2 }
  0x16   :  { %v33_v3 = vadd.s32 128, %v32_v2  ;;  %v34_v4 = vadd.s32 256, %v32_v2  ;;  %v35_v5 = vadd.s32 384, %v32_v2  ;;  %v38_v6 = vmul.u32 512, %v247_v1  ;;  %p186_p8 = scmp.ne.s32.totalorder %s152_s2, %s185_s27  ;;  %p191_p10 = scmp.lt.s32.totalorder %s185_s27, %s185_s27 }
  0x17   :  { %v89_v37 = vsub.s32 0, %v247_v1  ;;  %v85_v42 = vmul.f32 1.1111112, %v28_v28  ;;  %v93_v43 = vsub.s32 1, %v247_v1  ;;  %v97_v46 = vsub.s32 2, %v247_v1 }
  0x18   :  { %v39_v8 = vadd.s32 %v38_v6, %v32_v2  ;;  %v40_v9 = vadd.s32 %v38_v6, %v33_v3  ;;  %v41_v10 = vadd.s32 %v38_v6, %v34_v4  ;;  %v42_v11 = vadd.s32 %v38_v6, %v35_v5  ;;  %p192_p11 = por %p191_p10, %p190_p9 }
  0x19   :  { %v101_v47 = vsub.s32 3, %v247_v1  ;;  %v90_v55 = vrot.slane %v85_v42, %v89_v37  ;;  %v94_v56 = vrot.slane %v85_v42, %v93_v43  ;;  %v98_v59 = vrot.slane %v85_v42, %v97_v46 }
  0x1a   :  { %v45_v12 = vxor.u32 %v44_v7, %v39_v8  ;;  %v46_v13 = vxor.u32 %v44_v7, %v40_v9  ;;  %v47_v14 = vxor.u32 %v44_v7, %v41_v10  ;;  %v48_v15 = vxor.u32 %v44_v7, %v42_v11  ;;  %p193_p12 = pnand %p192_p11, %p186_p8 }
  0x1b   :  { %v102_v60 = vrot.slane %v85_v42, %v101_v47  ;;  %v122_v63 = vsub.s32 %v119_v52, %v247_v1 }
  0x1c   :  { %v49_v16 = vshrl.u32 %v45_v12, 16  ;;  %v50_v17 = vshrl.u32 %v46_v13, 16  ;;  %v51_v18 = vshrl.u32 %v47_v14, 16  ;;  %v52_v19 = vshrl.u32 %v48_v15, 16 }
  0x1e   :  { %v53_v22 = vxor.u32 %v49_v16, %v45_v12  ;;  %v54_v23 = vxor.u32 %v50_v17, %v46_v13  ;;  %v55_v24 = vxor.u32 %v51_v18, %v47_v14  ;;  %v56_v25 = vxor.u32 %v52_v19, %v48_v15 }
  0x20   :  { %v57_v26 = vmul.u32 2146121005, %v53_v22  ;;  %v58_v27 = vmul.u32 2146121005, %v54_v23 }
  0x21   :  { %v59_v29 = vmul.u32 2146121005, %v55_v24  ;;  %v60_v30 = vmul.u32 2146121005, %v56_v25 }
  0x22   :  { %v61_v31 = vshrl.u32 %v57_v26, 15  ;;  %v62_v32 = vshrl.u32 %v58_v27, 15 }
  0x23   :  { %v63_v33 = vshrl.u32 %v59_v29, 15  ;;  %v64_v34 = vshrl.u32 %v60_v30, 15 }
  0x24   :  { %v65_v35 = vxor.u32 %v61_v31, %v57_v26  ;;  %v66_v36 = vxor.u32 %v62_v32, %v58_v27 }
  0x25   :  { %v67_v40 = vxor.u32 %v63_v33, %v59_v29  ;;  %v68_v41 = vxor.u32 %v64_v34, %v60_v30 }
  0x26   :  { %v69_v44 = vmul.u32 2221713035, %v65_v35  ;;  %v70_v45 = vmul.u32 2221713035, %v66_v36 }
  0x27   :  { %v71_v48 = vmul.u32 2221713035, %v67_v40  ;;  %v72_v49 = vmul.u32 2221713035, %v68_v41 }
  0x28   :  { %v73_v50 = vshrl.u32 %v69_v44, 16  ;;  %v74_v51 = vshrl.u32 %v70_v45, 16 }
  0x29   :  { %v75_v53 = vshrl.u32 %v71_v48, 16  ;;  %v76_v54 = vshrl.u32 %v72_v49, 16 }
  0x2a   :  { %v77_v57 = vxor.u32 %v73_v50, %v69_v44  ;;  %v78_v58 = vxor.u32 %v74_v51, %v70_v45 }
  0x2b   :  { %v79_v61 = vxor.u32 %v75_v53, %v71_v48  ;;  %v80_v62 = vxor.u32 %v76_v54, %v72_v49 }
  0x2c   :  { %vm81_vm0 = vcmp.ge.u32.totalorder %v77_v57, 429496730  ;;  %vm82_vm1 = vcmp.ge.u32.totalorder %v78_v58, 429496730 }
  0x2d   :  { %vm83_vm2 = vcmp.ge.u32.totalorder %v79_v61, 429496730  ;;  %vm84_vm3 = vcmp.ge.u32.totalorder %v80_v62, 429496730  ;;  %v107_v2 = vsel %vm81_vm0, %v90_v55, 0.0  ;;  %v108_v3 = vsel %vm82_vm1, %v94_v56, 0.0 }
  0x2e   :  { %v109_v4 = vsel %vm83_vm2, %v98_v59, 0.0  ;;  %v110_v5 = vsel %vm84_vm3, %v102_v60, 0.0  ;;  %v115_v6 = vcombine.low %v107_v2, %v108_v3 }
  0x2f   :  { %v116_v7 = vcombine.low %v109_v4, %v110_v5 }
  0x30   :  { %v123_v8 = vrot.slane %v115_v6, %v122_v63 }
  0x31   :  { %v130_v9 = vrot.slane %v116_v7, %v122_v63 }
  0x33   :  { %v131_v10 = vcombine.low %v123_v8, %v130_v9 }
  0x35   :  { %v138_v11 = vrot.slane %v131_v10, %v122_v63 }
  0x37   :  { %144 = vst.msk [vmem:[#allocation7] sm:$0xf] %vm142_vm4, %v138_v11 }
  0x38   :  { %196 = shalt.err (!%p193_p12)
}
  0x39   :  { %s197_s30 = scalar_lea.hbm %s278_s3, 64 }
  0x3a   :  { %p198_p13 = scmp.ne.s32.totalorder %s278_s3, %s197_s30  ;;  %p201_p0 = scmp.lt.u32.totalorder %s197_s30, %s278_s3 }
  0x3c   :  { %p203_p1 = pnand %p201_p0, %p198_p13 }
  0x3e   :  { %206 = shalt.err (!%p203_p1)
}
  0x3f   :  { %154 = dma.vmem_to_hbm [thread:$0]  %s152_s2, 64, %s278_s3, [#allocation6]  }
  0x40   :  { %209 = dma.done.wait [#allocation6], 64  }
  0x41   :  { %210 = vsyncadd [#allocation6], 4294967232 }
  0x42   :  { %158 = vsyncpa [#allocation5], 1 }
  0x43   :  { %159 = vsyncpa [#allocation6], 1 }

</bundles_post_ra>
